<compile_context>
chip_gen: v6e
topology: v6e:2x2x1
jax: 0.10.0
libtpu: 0.0.40
codegen_flags: <defaults>
</compile_context>

<pallas_src>
import jax
import jax.numpy as jnp
from jax.experimental import pallas as pl
from jax.experimental.pallas import tpu as pltpu

KH = 4
KW = 4
STRIDE = 2
PAD = 1
LANE = 128
SUBLANE = 8


def disback_kernel(x_ref, w_ref, o_ref):
    """Fused (im2col'd) conv + folded Linear(1,1) + sigmoid.

    x_ref : (Kp, TM) im2col block -- contraction on sublanes, output rows on lanes
    w_ref : (Kp, 1)  conv weight with the Linear(1,1) scale folded in
    o_ref : (1, TM)  sigmoid(w . x) per output row (lane-dense store)
    """
    prod = x_ref[...] * w_ref[...]               # VPU multiply, lane-broadcast of w
    s = jnp.sum(prod, axis=0, keepdims=True)     # single sublane (XLU) reduction -> (1, TM)
    o_ref[...] = jax.nn.sigmoid(s)               # exp/reciprocal ride the EUP slot


def _round_up(v, m):
    return (v + m - 1) // m * m


def disback_forward(img_nchw, conv_w, lin_w):
    """img_nchw: (N, C, H, W) f32 (PyTorch layout), conv_w: (1, C, 4, 4), lin_w: (1, 1)."""
    N, C, H, W = img_nchw.shape
    Ho = (H + 2 * PAD - KH) // STRIDE + 1
    Wo = (W + 2 * PAD - KW) // STRIDE + 1
    # nn.Linear(1,1) requires the conv output's last dim to be 1 (PyTorch would
    # error otherwise), so the module only runs with W == 2.
    assert Wo == 1, "DisBack only valid when conv output width == 1 (input W == 2)"

    # ---- glue: zero-pad + im2col (lane-dense relayout), pure data movement ----
    x = img_nchw.astype(jnp.float32)
    x_pad = jnp.pad(x, ((0, 0), (0, 0), (PAD, PAD), (PAD, PAD)))      # (N, C, Hp, Wp)

    # windows[n, c, kh, kw, oh, ow] = x_pad[n, c, oh*S + kh, ow*S + kw]
    rows = []
    for kh in range(KH):
        cols = []
        for kw in range(KW):
            sl = x_pad[:, :,
                       kh: kh + STRIDE * (Ho - 1) + 1: STRIDE,
                       kw: kw + STRIDE * (Wo - 1) + 1: STRIDE]        # (N, C, Ho, Wo)
            cols.append(sl)
        rows.append(jnp.stack(cols, axis=2))                          # (N, C, KW, Ho, Wo)
    windows = jnp.stack(rows, axis=2)                                 # (N, C, KH, KW, Ho, Wo)

    K = C * KH * KW
    M = N * Ho * Wo
    # Contraction ordered (c, kh, kw) to match conv_w[0].reshape(-1);
    # rows ordered (n, oh, ow) to match the final view(-1, 1).
    x_t = jnp.transpose(windows, (1, 2, 3, 0, 4, 5)).reshape(K, M)    # (K, M)

    # Fold Linear(1,1,bias=False) into the conv weight (both are linear -> exact).
    w = (conv_w[0].astype(jnp.float32) * lin_w.astype(jnp.float32)[0, 0]).reshape(K, 1)

    # Pad to lane/sublane-friendly sizes. Zero weight rows contribute nothing;
    # padded output columns are sliced off below.
    Kp = _round_up(K, SUBLANE)
    TM = 512
    if M <= TM:
        TM = _round_up(max(M, 1), LANE)
    Mp = _round_up(M, TM)
    x_t = jnp.pad(x_t, ((0, Kp - K), (0, Mp - M)))
    w = jnp.pad(w, ((0, Kp - K), (0, 0)))

    out = pl.pallas_call(
        disback_kernel,
        out_shape=jax.ShapeDtypeStruct((1, Mp), jnp.float32),
        grid=(Mp // TM,),
        in_specs=[
            pl.BlockSpec((Kp, TM), lambda i: (0, i)),   # im2col tile
            pl.BlockSpec((Kp, 1), lambda i: (0, 0)),    # folded weight (resident)
        ],
        out_specs=pl.BlockSpec((1, TM), lambda i: (0, i)),
        compiler_params=pltpu.CompilerParams(
            dimension_semantics=("parallel",)),
    )(x_t, w)

    return out[0, :M].reshape(-1, 1)                    # view(-1, 1)


def disback_reference(img_nchw, conv_w, lin_w):
    """Pure-JAX reference mirroring the PyTorch module."""
    y = jax.lax.conv_general_dilated(
        img_nchw.astype(jnp.float32), conv_w.astype(jnp.float32),
        window_strides=(STRIDE, STRIDE),
        padding=((PAD, PAD), (PAD, PAD)),
        dimension_numbers=("NCHW", "OIHW", "NCHW"))
    y = y * lin_w[0, 0]                                 # Linear(1,1,bias=False) on last dim == 1
    y = jax.nn.sigmoid(y)
    return y.reshape(-1, 1)


if __name__ == "__main__":
    numFilters = 1
    C = numFilters * 4
    N, H, W = 2, 16, 2                                  # W=2 -> conv output width 1

    key = jax.random.PRNGKey(0)
    k_img, k_conv, k_lin = jax.random.split(key, 3)
    img = jax.random.normal(k_img, (N, C, H, W), jnp.float32)
    # utils.initialize_weights -> N(0, 0.02) style init, done deterministically here.
    conv_w = 0.02 * jax.random.normal(k_conv, (1, C, KH, KW), jnp.float32)
    lin_w = 0.02 * jax.random.normal(k_lin, (1, 1), jnp.float32)

    out = disback_forward(img, conv_w, lin_w)
    out = jax.block_until_ready(out)

    ref = jax.block_until_ready(disback_reference(img, conv_w, lin_w))
    assert out.shape == ref.shape == (N * H // 2, 1)
    assert jnp.allclose(out, ref, atol=1e-5, rtol=1e-5), (out, ref)

    print("KERNEL_OK")
</pallas_src>

<mosaic_0001>
module attributes {stable_mosaic.version = 11 : i64} {
  func.func @disback_kernel(%arg0: i32, %arg1: memref<64x128xf32, #tpu.memory_space<vmem>>, %arg2: memref<64x1xf32, #tpu.memory_space<vmem>>, %arg3: memref<1x128xf32, #tpu.memory_space<vmem>>) attributes {dimension_semantics = [#tpu.dimension_semantics<parallel>], iteration_bounds = array<i64: 1>, scalar_prefetch = 0 : i64, scratch_operands = 0 : i64, tpu.core_type = #tpu.core_type<tc>, window_params = [{transform_indices = @transform_0, window_bounds = array<i64: 64, 128>}, {pipeline_mode = #tpu.pipeline_mode<synchronous>, transform_indices = @transform_1, window_bounds = array<i64: 64, 1>}, {transform_indices = @transform_2, window_bounds = array<i64: 1, 128>}]} {
    %c0 = arith.constant 0 : index
    %c0_0 = arith.constant 0 : index
    %0 = vector.load %arg1[%c0, %c0_0] : memref<64x128xf32, #tpu.memory_space<vmem>>, vector<64x128xf32>
    %c0_1 = arith.constant 0 : index
    %c0_2 = arith.constant 0 : index
    %1 = vector.load %arg2[%c0_1, %c0_2] : memref<64x1xf32, #tpu.memory_space<vmem>>, vector<64x1xf32>
    %2 = vector.broadcast %1 : vector<64x1xf32> to vector<64x128xf32>
    %3 = arith.mulf %0, %2 : vector<64x128xf32>
    %cst = arith.constant dense<0.000000e+00> : vector<128xf32>
    %4 = vector.multi_reduction <add>, %3, %cst [0] : vector<64x128xf32> to vector<128xf32>
    %5 = vector.shape_cast %4 : vector<128xf32> to vector<1x128xf32>
    %6 = arith.negf %5 : vector<1x128xf32>
    %7 = math.exp %6 : vector<1x128xf32>
    %cst_3 = arith.constant 1.000000e+00 : f32
    %8 = vector.broadcast %cst_3 : f32 to vector<1x128xf32>
    %9 = arith.addf %8, %7 : vector<1x128xf32>
    %10 = arith.divf %8, %9 : vector<1x128xf32>
    %c0_4 = arith.constant 0 : index
    %c0_5 = arith.constant 0 : index
    %11 = vector.load %arg3[%c0_4, %c0_5] : memref<1x128xf32, #tpu.memory_space<vmem>>, vector<1x128xf32>
    tpu.vector_store %arg3[%c0_4, %c0_5], %10 {strides = array<i32>} : memref<1x128xf32, #tpu.memory_space<vmem>>, vector<1x128xf32>,
    return
  }
  func.func @transform_0(%arg0: i32) -> (i32, i32) {
    %c0_i32 = arith.constant 0 : i32
    %c0_i32_0 = arith.constant 0 : i32
    return %c0_i32, %arg0 : i32, i32
  }
  func.func @transform_1(%arg0: i32) -> (i32, i32) {
    %c0_i32 = arith.constant 0 : i32
    %c0_i32_0 = arith.constant 0 : i32
    %c0_i32_1 = arith.constant 0 : i32
    return %c0_i32, %c0_i32_0 : i32, i32
  }
  func.func @transform_2(%arg0: i32) -> (i32, i32) {
    %c0_i32 = arith.constant 0 : i32
    %c0_i32_0 = arith.constant 0 : i32
    return %c0_i32, %arg0 : i32, i32
  }
}

</mosaic_0001>

<bundles_post_ra>
// kernel: tpu_custom_call.1
= control target key start
LH: loop header
LB: loop body
LE: loop exit
PB: predicated region body
PF: predicated region fallthrough
CT: control target
= control target key end

     0   :  { %v141_v2 = vmov 0   ;;  %s209_s0 = inlined_call_operand.vmem [shape: f32[64,128], index: 0, kind: input, shape index: {}]   ;;  %s210_s1 = inlined_call_operand.vmem [shape: f32[64,1], index: 1, kind: input, shape index: {}]   ;;  %s211_s2 = inlined_call_operand.hbm [shape: f32[1,128], index: 2, kind: output, shape index: {}]  }
   0x1   :  { %v22_v0 = vld [vmem:[%s210_s1 + $0x10] sm:$0xff]  ;;  %v20_v1 = vld [vmem:[%s210_s1] sm:$0xff]  ;;  %114 = vset.pattern.permute.xlu1 %v141_v2  ;;  %113 = vset.pattern.permute.xlu0 %v141_v2  ;;  %v23_v3 = vld [vmem:[%s210_s1 + $0x18] sm:$0xff] }
   0x2   :  { %40 = vperm.xlu1 %114, %v22_v0   ;;  %30 = vperm.xlu0 %113, %v20_v1   ;;  %v21_v4 = vld [vmem:[%s210_s1 + $0x8] sm:$0xff] }
   0x3   :  { %7 = vsyncpa [#allocation3], 0  ;;  %v25_v5 = vld [vmem:[%s210_s1 + $0x28] sm:$0xff]  ;;  %v24_v6 = vld [vmem:[%s210_s1 + $0x20] sm:$0xff]  ;;  %s142_s12 = smov [#allocation2]  }
   0x4   :  { %v27_v7 = vld [vmem:[%s210_s1 + $0x38] sm:$0xff]  ;;  %v26_v8 = vld [vmem:[%s210_s1 + $0x30] sm:$0xff]  ;;  %v12_v11 = vld [vmem:[%s209_s0] sm:$0xff]  ;;  %s102_s13 = sshll.u32 %s142_s12, 4  ;;  %s103_s13 = int_to_ptr.vmem [resolvable:$true] %s102_s13 }
   0x5   :  { %v13_v12 = vld [vmem:[%s209_s0 + $0x8] sm:$0xff]  ;;  %v14_v13 = vld [vmem:[%s209_s0 + $0x10] sm:$0xff]  ;;  %v15_v18 = vld [vmem:[%s209_s0 + $0x18] sm:$0xff]  ;;  %s123_s14 = scalar_lea.vmem %s103_s13, 32  ;;  %p124_p1 = scmp.lt.s32.totalorder %s103_s13, %s103_s13 }
   0x6   :  { %45 = vperm.xlu1 %114, %v23_v3   ;;  %35 = vperm.xlu0 %113, %v21_v4   ;;  %v16_v23 = vld [vmem:[%s209_s0 + $0x20] sm:$0xff]  ;;  %v17_v26 = vld [vmem:[%s209_s0 + $0x28] sm:$0xff]  ;;  %v18_v30 = vld [vmem:[%s209_s0 + $0x30] sm:$0xff] }
   0x7   :  { %v19_v34 = vld [vmem:[%s209_s0 + $0x38] sm:$0xff]  ;;  %s119_s0 = scalar_lea.vmem %s103_s13, 16 }
   0x8   :  { %p120_p0 = scmp.ne.s32.totalorder %s103_s13, %s119_s0  ;;  %p125_p2 = scmp.lt.s32.totalorder %s123_s14, %s119_s0 }
   0xa   :  { %55 = vperm.xlu1 %114, %v25_v5   ;;  %50 = vperm.xlu0 %113, %v24_v6   ;;  %p126_p3 = por %p125_p2, %p124_p1 }
   0xc   :  { %p127_p4 = pnand %p126_p3, %p120_p0 }
   0xe   :  { %65 = vperm.xlu1 %114, %v27_v7   ;;  %60 = vperm.xlu0 %113, %v26_v8  }
  0x7d   :  { %v41_v9 = vpop.permute.xlu1 %40  ;;  %v31_v10 = vpop.permute.xlu0 %30 }
  0x7e   :  { %v68_v16 = vmul.f32 %v31_v10, %v12_v11  ;;  %v70_v19 = vmul.f32 %v41_v9, %v14_v13 }
  0x81   :  { %v46_v14 = vpop.permute.xlu1 %45  ;;  %v36_v15 = vpop.permute.xlu0 %35 }
  0x82   :  { %v69_v17 = vmul.f32 %v36_v15, %v13_v12  ;;  %v71_v24 = vmul.f32 %v46_v14, %v15_v18 }
  0x84   :  { %v76_v20 = vadd.f32 %v69_v17, %v68_v16 }
  0x85   :  { %v56_v21 = vpop.permute.xlu1 %55  ;;  %v51_v22 = vpop.permute.xlu0 %50 }
  0x86   :  { %v77_v25 = vadd.f32 %v76_v20, %v70_v19  ;;  %v72_v27 = vmul.f32 %v51_v22, %v16_v23  ;;  %v73_v31 = vmul.f32 %v56_v21, %v17_v26 }
  0x88   :  { %v78_v28 = vadd.f32 %v77_v25, %v71_v24 }
  0x89   :  { %v61_v29 = vpop.permute.xlu0 %60  ;;  %v66_v33 = vpop.permute.xlu1 %65 }
  0x8a   :  { %v79_v32 = vadd.f32 %v78_v28, %v72_v27  ;;  %v74_v35 = vmul.f32 %v61_v29, %v18_v30  ;;  %v75_v37 = vmul.f32 %v66_v33, %v19_v34 }
  0x8c   :  { %v80_v36 = vadd.f32 %v79_v32, %v73_v31 }
  0x8e   :  { %v81_v38 = vadd.f32 %v80_v36, %v74_v35 }
  0x90   :  { %v82_v39 = vadd.f32 %v81_v38, %v75_v37 }
  0x92   :  { %v83_v40 = vrot.slane %v82_v39, 4 }
  0x94   :  { %v84_v41 = vadd.f32 %v83_v40, %v82_v39 }
  0x96   :  { %v85_v42 = vrot.slane %v84_v41, 2 }
  0x98   :  { %v86_v43 = vadd.f32 %v85_v42, %v84_v41 }
  0x9a   :  { %v87_v44 = vrot.slane %v86_v43, 1 }
  0x9c   :  { %v88_v45 = vadd.f32 %v87_v44, %v86_v43 }
  0x9e   :  { %v110_v46 = vmul.f32 -1.442695, %v88_v45 }
  0xa0   :  { %115 = vpow2.f32 %v110_v46 }
  0xad   :  { %v116_v47 = vpop.eup %115 }
  0xae   :  { %v92_v48 = vadd.f32 1.0, %v116_v47 }
  0xb0   :  { %117 = vrcp.f32 %v92_v48 }
  0xbd   :  { %v118_v49 = vpop.eup %117 }
  0xbe   :  { %95 = vst [vmem:[#allocation2] sm:$0x1] %v118_v49 }
  0xbf   :  { %130 = shalt.err (!%p127_p4)
}
  0xc0   :  { %105 = dma.vmem_to_hbm [thread:$0]  %s103_s13, 16, %s211_s2, [#allocation3]  }
  0xc1   :  { %139 = dma.done.wait [#allocation3], 16  }
  0xc2   :  { %140 = vsyncadd [#allocation3], 4294967280 }
  0xc3   :  { %109 = vsyncpa [#allocation3], 1 }

</bundles_post_ra>
